<compile_context>
chip_gen: v6e
topology: v6e:2x2x1
jax: 0.10.0
libtpu: 0.0.40
codegen_flags: <defaults>
</compile_context>

<pallas_src>
import functools

import jax
import jax.numpy as jnp
import numpy as np
from jax import lax
from jax.experimental import pallas as pl
from jax.experimental.pallas import tpu as pltpu


LANE = 128
DEFAULT_TM = 512          # rows per M tile
MAX_TK = 2048             # whole reduction in one block when K <= this
MAX_TN = 256              # output-channel tile for Np < 1024
MAX_TN_WIDE = 512         # output-channel tile for Np >= 1024
VMEM_LIMIT_BYTES = 32 * 1024 * 1024   # fits v5e/v6e (128 MiB) and v7x (64 MiB)


def _round_up(x, m):
    return (x + m - 1) // m * m


def _pick_tile(dim, max_tile):
    """Largest multiple of LANE <= max_tile that divides dim."""
    t = min(max_tile, dim)
    while t > LANE and dim % t != 0:
        t -= LANE
    return t


# ----------------------------------------------------------------------------
# Pallas kernels: fused matmul + shift (+ residual) (+ relu)
# (BN scale is already folded into the weight columns.)
# ----------------------------------------------------------------------------
def _mm_kernel(x_ref, w_ref, b_ref, o_ref, *, relu):
    # Single reduction block: no scratch accumulator, no init/finalize.
    y = jnp.dot(x_ref[...], w_ref[...],
                preferred_element_type=jnp.float32) + b_ref[...]
    if relu:
        y = jnp.maximum(y, 0.0)
    o_ref[...] = y.astype(o_ref.dtype)


def _mm_res_kernel(x_ref, w_ref, b_ref, r_ref, o_ref, *, relu):
    y = (jnp.dot(x_ref[...], w_ref[...], preferred_element_type=jnp.float32)
         + b_ref[...] + r_ref[...].astype(jnp.float32))
    if relu:
        y = jnp.maximum(y, 0.0)
    o_ref[...] = y.astype(o_ref.dtype)


def _mm_kernel_k(x_ref, w_ref, b_ref, o_ref, acc_ref, *, relu):
    # K grid axis (only used when K > MAX_TK).  Step 0 assigns instead of
    # zero-init + accumulate.
    k = pl.program_id(2)
    part = jnp.dot(x_ref[...], w_ref[...], preferred_element_type=jnp.float32)

    @pl.when(k == 0)
    def _():
        acc_ref[...] = part

    @pl.when(k > 0)
    def _():
        acc_ref[...] += part

    @pl.when(k == pl.num_programs(2) - 1)
    def _():
        y = acc_ref[...] + b_ref[...]
        if relu:
            y = jnp.maximum(y, 0.0)
        o_ref[...] = y.astype(o_ref.dtype)


def _conv3x3_kernel(x_ref, w_ref, b_ref, o_ref, *, ho, wo, relu):
    """3x3 stride-1 conv for one image: taps folded inside the kernel.

    x_ref: (1, ho+2, wo+2, cp) bf16 spatially padded activation
    w_ref: (9, cp, tn) bf16 (BN scale folded), b_ref: (1, tn) f32 shift
    o_ref: (1, ho, wo, tn)
    """
    cp = x_ref.shape[3]
    tn = o_ref.shape[3]
    acc = None
    for t in range(9):
        di, dj = t // 3, t % 3
        patch = x_ref[0, di:di + ho, dj:dj + wo, :].reshape(ho * wo, cp)
        part = jnp.dot(patch, w_ref[t], preferred_element_type=jnp.float32)
        acc = part if acc is None else acc + part
    y = acc + b_ref[...]
    if relu:
        y = jnp.maximum(y, 0.0)
    o_ref[0] = y.reshape(ho, wo, tn).astype(o_ref.dtype)


# ----------------------------------------------------------------------------
# Wrappers
# ----------------------------------------------------------------------------
def _xla_matmul(x, w_p, shift_p, relu, residual, out_dtype):
    y = jnp.dot(x, w_p, preferred_element_type=jnp.float32) + shift_p[None, :]
    if residual is not None:
        y = y + residual.astype(jnp.float32)
    if relu:
        y = jnp.maximum(y, 0.0)
    return y.astype(out_dtype)


def fused_matmul(x, w_p, shift_p, *, relu, residual=None,
                 out_dtype=jnp.float32, use_pallas=True, tm=DEFAULT_TM,
                 logical_nk=None):
    """y = maybe_relu(x @ W + shift [+ residual]).

    x:       (M, K)  cast to bf16
    w_p:     (K, Np) bf16 weight, BN scale folded, Np multiple of 128
    shift_p: (Np,) f32 folded BN shift
    residual:(M, Np) or None
    Returns (M, Np) in out_dtype (padded output channels are exact zeros).
    """
    M, K = x.shape
    Kp, Np = w_p.shape
    assert K == Kp, (K, Kp)

    x = x.astype(jnp.bfloat16)
    if residual is not None:
        residual = residual.astype(jnp.bfloat16)
    n_log, k_log = logical_nk if logical_nk is not None else (Np, Kp)

    # Tiny matmuls (classifier-sized): launch/tiling overhead dominates.
    small = (M < 8) or (M * Np * Kp < (1 << 16))
    if (not use_pallas) or small:
        return _xla_matmul(x, w_p, shift_p, relu, residual, out_dtype)

    # --- tile selection ------------------------------------------------
    tn = _pick_tile(Np, MAX_TN_WIDE if Np >= 1024 else MAX_TN)
    tm_eff = min(tm, _round_up(M, 8))
    gm = pl.cdiv(M, tm_eff)
    # v7x has 2 TensorCores: keep >= 2 parallel grid points when cheap
    # (costs at most one extra ~0.35us grid step on 1-TC chips).
    if gm * (Np // tn) < 2:
        if Np >= 2 * LANE and (Np // 2) % LANE == 0:
            tn = Np // 2
        elif M >= 256:
            tm_eff = _round_up(pl.cdiv(M, 2), 8)
            gm = pl.cdiv(M, tm_eff)
    gn = Np // tn

    b2 = shift_p.reshape(1, Np)
    out_itemsize = np.dtype(out_dtype).itemsize
    cost = pl.CostEstimate(
        flops=2 * M * n_log * k_log,
        transcendentals=0,
        bytes_accessed=int(M * Kp * 2 + Kp * Np * 2 + Np * 4
                           + (M * Np * 2 if residual is not None else 0)
                           + M * Np * out_itemsize),
    )

    if Kp <= MAX_TK:
        # Whole reduction in one block -> no K axis, no accumulator scratch.
        grid = (gm, gn)
        in_specs = [
            pl.BlockSpec((tm_eff, Kp), lambda i, j: (i, 0)),
            pl.BlockSpec((Kp, tn), lambda i, j: (0, j)),
            pl.BlockSpec((1, tn), lambda i, j: (0, j)),
        ]
        args = [x, w_p, b2]
        scratch = []
        if residual is None:
            kernel = functools.partial(_mm_kernel, relu=relu)
        else:
            in_specs.append(pl.BlockSpec((tm_eff, tn), lambda i, j: (i, j)))
            args.append(residual)
            kernel = functools.partial(_mm_res_kernel, relu=relu)
        out_specs = pl.BlockSpec((tm_eff, tn), lambda i, j: (i, j))
        dim_sem = ("parallel", "parallel")
    else:
        # Residual-bearing layers always have K <= MAX_TK in ResNet-50; keep
        # only the residual-free K-axis variant.
        if residual is not None:
            return _xla_matmul(x, w_p, shift_p, relu, residual, out_dtype)
        tk = _pick_tile(Kp, MAX_TK)
        if Kp % tk != 0:
            return _xla_matmul(x, w_p, shift_p, relu, residual, out_dtype)
        grid = (gm, gn, Kp // tk)
        in_specs = [
            pl.BlockSpec((tm_eff, tk), lambda i, j, k: (i, k)),
            pl.BlockSpec((tk, tn), lambda i, j, k: (k, j)),
            pl.BlockSpec((1, tn), lambda i, j, k: (0, j)),
        ]
        args = [x, w_p, b2]
        scratch = [pltpu.VMEM((tm_eff, tn), jnp.float32)]
        kernel = functools.partial(_mm_kernel_k, relu=relu)
        out_specs = pl.BlockSpec((tm_eff, tn), lambda i, j, k: (i, j))
        dim_sem = ("parallel", "parallel", "arbitrary")

    return pl.pallas_call(
        kernel,
        out_shape=jax.ShapeDtypeStruct((M, Np), out_dtype),
        grid_spec=pltpu.PrefetchScalarGridSpec(
            num_scalar_prefetch=0,
            grid=grid,
            in_specs=in_specs,
            out_specs=out_specs,
            scratch_shapes=scratch),
        compiler_params=pltpu.CompilerParams(
            dimension_semantics=dim_sem,
            vmem_limit_bytes=VMEM_LIMIT_BYTES),
        cost_estimate=cost,
    )(*args)


def conv3x3_pallas(x_pad, w_p, shift_p, cout_p, *, relu, out_dtype,
                   cin_log, cout_log):
    """3x3 stride-1 conv (+BN shift, +ReLU) without im2col in HBM."""
    n, hp, wp, cp = x_pad.shape
    ho, wo = hp - 2, wp - 2
    w3 = w_p.reshape(9, cp, cout_p)
    b2 = shift_p.reshape(1, cout_p)

    tn = _pick_tile(cout_p, MAX_TN_WIDE if cout_p >= 1024 else MAX_TN)
    if (n * (cout_p // tn) < 2 and cout_p >= 2 * LANE
            and (cout_p // 2) % LANE == 0):
        tn = cout_p // 2          # keep both v7x TensorCores busy
    grid = (n, cout_p // tn)

    out_itemsize = np.dtype(out_dtype).itemsize
    cost = pl.CostEstimate(
        flops=2 * n * ho * wo * 9 * cin_log * cout_log,
        transcendentals=0,
        bytes_accessed=int(n * hp * wp * cp * 2 + 9 * cp * cout_p * 2
                           + cout_p * 4 + n * ho * wo * cout_p * out_itemsize),
    )
    kernel = functools.partial(_conv3x3_kernel, ho=ho, wo=wo, relu=relu)
    return pl.pallas_call(
        kernel,
        out_shape=jax.ShapeDtypeStruct((n, ho, wo, cout_p), out_dtype),
        grid_spec=pltpu.PrefetchScalarGridSpec(
            num_scalar_prefetch=0,
            grid=grid,
            in_specs=[
                pl.BlockSpec((1, hp, wp, cp), lambda b, j: (b, 0, 0, 0)),
                pl.BlockSpec((9, cp, tn), lambda b, j: (0, 0, j)),
                pl.BlockSpec((1, tn), lambda b, j: (0, j)),
            ],
            out_specs=pl.BlockSpec((1, ho, wo, tn), lambda b, j: (b, 0, 0, j))),
        compiler_params=pltpu.CompilerParams(
            dimension_semantics=("parallel", "parallel"),
            vmem_limit_bytes=VMEM_LIMIT_BYTES),
        cost_estimate=cost,
    )(x_pad, w3, b2)


def conv_bn(x, p, *, stride, relu, residual=None, use_pallas=True,
            out_dtype=jnp.bfloat16):
    """x: (N, H, W, Cstore) NHWC; channel dim already zero-padded to Cstore."""
    kh, kw, pad = p["kh"], p["kw"], p["pad"]
    cout_p = p["cout_p"]
    n, h, wdt, cs = x.shape
    assert cs == p["cin_store"], (cs, p["cin_store"])
    x = x.astype(jnp.bfloat16)
    if pad:
        x = jnp.pad(x, ((0, 0), (pad, pad), (pad, pad), (0, 0)))
    hp, wp = h + 2 * pad, wdt + 2 * pad
    ho = (hp - kh) // stride + 1
    wo = (wp - kw) // stride + 1
    logical_nk = (p["cout"], kh * kw * p["cin"])

    # 3x3 stride-1 convs: taps folded into the kernel (no 9x im2col in HBM).
    if (use_pallas and kh == 3 and kw == 3 and stride == 1
            and residual is None and ho * wo >= 8):
        return conv3x3_pallas(x, p["w_p"], p["shift_p"], cout_p, relu=relu,
                              out_dtype=out_dtype, cin_log=p["cin"],
                              cout_log=p["cout"])

    if kh == 1 and kw == 1 and stride == 1:
        patches = x.reshape(n * ho * wo, cs)
    elif kh == 1 and kw == 1:
        patches = x[:, ::stride, ::stride, :].reshape(n * ho * wo, cs)
    else:
        # TODO(synk): 7x7 stem / stride-2 3x3 convs still build im2col in XLA.
        cols = []
        for i in range(kh):
            for j in range(kw):
                cols.append(
                    x[:, i:i + stride * ho:stride, j:j + stride * wo:stride, :])
        patches = jnp.concatenate(cols, axis=-1).reshape(
            n * ho * wo, kh * kw * cs)

    res2d = None
    if residual is not None:
        res2d = residual.reshape(n * ho * wo, cout_p)

    y = fused_matmul(patches, p["w_p"], p["shift_p"], relu=relu,
                     residual=res2d, out_dtype=out_dtype,
                     use_pallas=use_pallas, logical_nk=logical_nk)
    return y.reshape(n, ho, wo, cout_p)


def maxpool_3x3_s2(x):
    # PyTorch MaxPool2d(kernel_size=3, stride=2, padding=1) on NHWC (XLA op).
    return lax.reduce_window(
        x, jnp.array(-jnp.inf, dtype=x.dtype), lax.max,
        window_dimensions=(1, 3, 3, 1),
        window_strides=(1, 2, 2, 1),
        padding=((0, 0), (1, 1), (1, 1), (0, 0)))


# ----------------------------------------------------------------------------
# Deterministic parameter construction (synthetic, no checkpoint loading).
# Weights are BN-scale-folded and zero-padded ONCE to padded channel counts.
# ----------------------------------------------------------------------------
class ParamGen:
    def __init__(self, key):
        self.key = key

    def next(self):
        self.key, sub = jax.random.split(self.key)
        return sub


def make_conv_bn(gen, kh, kw, cin, cout, pad, cin_store=None):
    if cin_store is None:
        cin_store = _round_up(cin, LANE)
    fan_in = kh * kw * cin
    w = jax.random.normal(gen.next(), (kh, kw, cin, cout),
                          jnp.float32) * np.sqrt(2.0 / fan_in)
    gamma = 1.0 + 0.1 * jax.random.normal(gen.next(), (cout,), jnp.float32)
    beta = 0.1 * jax.random.normal(gen.next(), (cout,), jnp.float32)
    mean = 0.1 * jax.random.normal(gen.next(), (cout,), jnp.float32)
    var = 1.0 + 0.1 * jax.random.uniform(gen.next(), (cout,), jnp.float32)
    scale = gamma / jnp.sqrt(var + 1e-5)
    shift = beta - mean * scale

    cout_p = _round_up(cout, LANE)
    # Fold BN scale into the weight columns in f32, then cast to bf16.
    w_scaled = (w * scale[None, None, None, :]).astype(jnp.bfloat16)
    w_full = jnp.zeros((kh, kw, cin_store, cout_p), jnp.bfloat16)
    w_full = w_full.at[:, :, :cin, :cout].set(w_scaled)
    w_p = w_full.reshape(kh * kw * cin_store, cout_p)
    shift_p = jnp.zeros((cout_p,), jnp.float32).at[:cout].set(shift)
    return {"kh": kh, "kw": kw, "cin": cin, "cout": cout, "pad": pad,
            "cin_store": cin_store, "cout_p": cout_p,
            "w_p": w_p, "shift_p": shift_p}


def make_bottleneck(gen, inplanes, planes, stride):
    p = {
        "conv1": make_conv_bn(gen, 1, 1, inplanes, planes, 0),
        "conv2": make_conv_bn(gen, 3, 3, planes, planes, 1),
        "conv3": make_conv_bn(gen, 1, 1, planes, planes * 4, 0),
        "stride": stride,
    }
    if stride != 1 or inplanes != planes * 4:
        p["downsample"] = make_conv_bn(gen, 1, 1, inplanes, planes * 4, 0)
    return p


def make_cdan_params(key, num_classes=31):
    gen = ParamGen(key)
    params = {"stem": make_conv_bn(gen, 7, 7, 3, 64, 3, cin_store=3),
              "layers": []}
    inplanes = 64
    for planes, blocks, stride in [(64, 3, 1), (128, 4, 2),
                                   (256, 6, 2), (512, 3, 2)]:
        layer = []
        for b in range(blocks):
            s = stride if b == 0 else 1
            layer.append(make_bottleneck(gen, inplanes, planes, s))
            inplanes = planes * 4
        params["layers"].append(layer)
    # ClassifierHead ~ Linear(2048 -> num_classes)
    params["fc_w"] = jax.random.normal(gen.next(), (2048, num_classes),
                                       jnp.float32) * 0.01
    params["fc_b"] = 0.01 * jax.random.normal(gen.next(), (num_classes,),
                                              jnp.float32)
    return params


# ----------------------------------------------------------------------------
# CDAN forward
# ----------------------------------------------------------------------------
def bottleneck_forward(x, p, use_pallas):
    if "downsample" in p:
        identity = conv_bn(x, p["downsample"], stride=p["stride"], relu=False,
                           use_pallas=use_pallas)
    else:
        identity = x
    out = conv_bn(x, p["conv1"], stride=1, relu=True, use_pallas=use_pallas)
    out = conv_bn(out, p["conv2"], stride=p["stride"], relu=True,
                  use_pallas=use_pallas)
    # conv3 + BN shift + residual add + relu fused in one Pallas kernel
    out = conv_bn(out, p["conv3"], stride=1, relu=True, residual=identity,
                  use_pallas=use_pallas)
    return out


def cdan_forward(params, x_nchw, use_pallas=True):
    """Returns (features (N, 2048), logits (N, num_classes)) like CDAN.forward."""
    x = jnp.transpose(x_nchw, (0, 2, 3, 1)).astype(jnp.float32)  # NCHW -> NHWC
    x = conv_bn(x, params["stem"], stride=2, relu=True, use_pallas=use_pallas)
    x = maxpool_3x3_s2(x)
    for layer in params["layers"]:
        for block in layer:
            x = bottleneck_forward(x, block, use_pallas)
    feat = jnp.mean(x.astype(jnp.float32), axis=(1, 2))  # (N, 2048) f32
    # Classifier head: tiny (batch x 2048 x num_classes) matmul -> plain XLA.
    logits = jnp.dot(feat, params["fc_w"],
                     precision=lax.Precision.HIGHEST) + params["fc_b"]
    return feat, logits


if __name__ == "__main__":
    key = jax.random.PRNGKey(0)
    pkey, xkey = jax.random.split(key)
    num_classes = 31
    params = make_cdan_params(pkey, num_classes=num_classes)

    # small deterministic input consistent with (N, C, H, W) images
    x = jax.random.normal(xkey, (2, 3, 32, 32), jnp.float32)

    feat, logits = cdan_forward(params, x, use_pallas=True)
    feat = jax.block_until_ready(feat)
    logits = jax.block_until_ready(logits)

    assert feat.shape == (2, 2048), feat.shape
    assert logits.shape == (2, num_classes), logits.shape
    assert bool(jnp.all(jnp.isfinite(feat))) and bool(jnp.all(jnp.isfinite(logits)))

    # pure-JAX (same folded bf16 weights) reference check of the whole forward
    feat_ref, logits_ref = cdan_forward(params, x, use_pallas=False)
    feat_ref = jax.block_until_ready(feat_ref)

    def relerr(a, b):
        return float(jnp.max(jnp.abs(a - b)) / (jnp.max(jnp.abs(b)) + 1e-6))

    assert relerr(feat, feat_ref) < 2e-2, relerr(feat, feat_ref)
    assert relerr(logits, logits_ref) < 2e-2, relerr(logits, logits_ref)

    print("KERNEL_OK")
</pallas_src>

<mosaic_0001>
module attributes {stable_mosaic.version = 11 : i64} {
  func.func @_mm_kernel(%arg0: i32, %arg1: i32, %arg2: memref<256x147xbf16, #tpu.memory_space<vmem>>, %arg3: memref<147x128xbf16, #tpu.memory_space<vmem>>, %arg4: memref<1x128xf32, #tpu.memory_space<vmem>>, %arg5: memref<256x128xbf16, #tpu.memory_space<vmem>>) attributes {dimension_semantics = [#tpu.dimension_semantics<parallel>, #tpu.dimension_semantics<parallel>], iteration_bounds = array<i64: 2, 1>, scalar_prefetch = 0 : i64, scratch_operands = 0 : i64, tpu.core_type = #tpu.core_type<tc>, window_params = [{transform_indices = @transform_0, window_bounds = array<i64: 256, 147>}, {transform_indices = @transform_1, window_bounds = array<i64: 147, 128>}, {transform_indices = @transform_2, window_bounds = array<i64: 1, 128>}, {transform_indices = @transform_3, window_bounds = array<i64: 256, 128>}]} {
    %c0 = arith.constant 0 : index
    %c0_0 = arith.constant 0 : index
    %0 = vector.load %arg2[%c0, %c0_0] : memref<256x147xbf16, #tpu.memory_space<vmem>>, vector<256x147xbf16>
    %c0_1 = arith.constant 0 : index
    %c0_2 = arith.constant 0 : index
    %1 = vector.load %arg3[%c0_1, %c0_2] : memref<147x128xbf16, #tpu.memory_space<vmem>>, vector<147x128xbf16>
    %cst = arith.constant dense<0.000000e+00> : vector<256x128xf32>
    %2 = tpu.matmul %0, %1, %cst {dimension_numbers = #tpu.dot_dimension_numbers<[1], [0], [0], [1], [0, 0, 1, 1], [], []>} : vector<256x147xbf16>, vector<147x128xbf16>, vector<256x128xf32> -> vector<256x128xf32>
    %c0_3 = arith.constant 0 : index
    %c0_4 = arith.constant 0 : index
    %3 = vector.load %arg4[%c0_3, %c0_4] : memref<1x128xf32, #tpu.memory_space<vmem>>, vector<1x128xf32>
    %4 = vector.broadcast %3 : vector<1x128xf32> to vector<256x128xf32>
    %5 = arith.addf %2, %4 : vector<256x128xf32>
    %cst_5 = arith.constant 0.000000e+00 : f32
    %6 = vector.broadcast %cst_5 : f32 to vector<256x128xf32>
    %7 = arith.maximumf %5, %6 : vector<256x128xf32>
    %8 = arith.truncf %7 : vector<256x128xf32> to vector<256x128xbf16>
    %c0_6 = arith.constant 0 : index
    %c0_7 = arith.constant 0 : index
    %9 = vector.load %arg5[%c0_6, %c0_7] : memref<256x128xbf16, #tpu.memory_space<vmem>>, vector<256x128xbf16>
    tpu.vector_store %arg5[%c0_6, %c0_7], %8 {strides = array<i32>} : memref<256x128xbf16, #tpu.memory_space<vmem>>, vector<256x128xbf16>,
    return
  }
  func.func @transform_0(%arg0: i32, %arg1: i32) -> (i32, i32) {
    %c0_i32 = arith.constant 0 : i32
    %c0_i32_0 = arith.constant 0 : i32
    return %arg0, %c0_i32 : i32, i32
  }
  func.func @transform_1(%arg0: i32, %arg1: i32) -> (i32, i32) {
    %c0_i32 = arith.constant 0 : i32
    %c0_i32_0 = arith.constant 0 : i32
    return %c0_i32, %arg1 : i32, i32
  }
  func.func @transform_2(%arg0: i32, %arg1: i32) -> (i32, i32) {
    %c0_i32 = arith.constant 0 : i32
    %c0_i32_0 = arith.constant 0 : i32
    return %c0_i32, %arg1 : i32, i32
  }
  func.func @transform_3(%arg0: i32, %arg1: i32) -> (i32, i32) {
    %c0_i32 = arith.constant 0 : i32
    return %arg0, %arg1 : i32, i32
  }
}

</mosaic_0001>

<bundles_post_ra>
// kernel: tpu_custom_call.1
= control target key start
LH: loop header
LB: loop body
LE: loop exit
PB: predicated region body
PF: predicated region fallthrough
CT: control target
= control target key end

     0   :  { %8 = vsyncpa [#allocation3], 0  ;;  %s1732_s0 = inlined_call_operand.vmem [shape: bf16[512,147], index: 0, kind: input, shape index: {}]   ;;  %s1733_s1 = inlined_call_operand.vmem [shape: bf16[147,128], index: 1, kind: input, shape index: {}]   ;;  %s1734_s2 = inlined_call_operand.vmem [shape: f32[1,128], index: 2, kind: input, shape index: {}]   ;;  %s1735_s3 = inlined_call_operand.hbm [shape: bf16[512,128], index: 3, kind: output, shape index: {}]  }
   0x1   :  { %10 = vsyncpa [#allocation3 + $0x1], 0  ;;  %s1479_s12 = smov 0   ;;  %s1481_s13 = smov 0  }
   0x2   :  { %s1483_s14 = smov 0   ;;  %s1485_s15 = smov 0  }
   0x3   :  { %s1487_s16 = smov 0   ;;  %s1489_s17 = smov 0  }
   0x4 LB: > { %s1003_s18 = sadd.s32 4294967295, %s1452_s17   ;;  %s1004_s19 = sadd.s32 4294967294, %s1452_s17   ;;  %s1452_s17 = sphi %s1489_s17, %s16_s17   ;;  %s1448_s16 = sphi %s1487_s16, %s1742_s16   ;;  %s1444_s15 = sphi %s1485_s15, %s1741_s15   ;;  %s1440_s14 = sphi %s1483_s14, %s1740_s14   ;;  %s1436_s13 = sphi %s1481_s13, %s1739_s13   ;;  %s1432_s12 = sphi %s1479_s12, %s1738_s12  }
   0x5   : > { %s28_s20 = sadd.s32 1, %s1448_s16  ;;  %s115_s21 = sadd.s32 1, %s1440_s14 }
   0x6   : > { %p30_p0 = scmp.ge.s32.totalorder %s28_s20, 2  ;;  %p125_p1 = scmp.ne.s32.totalorder %s1440_s14, %s1436_s13 }
   0x7   : > { %p126_p2 = scmp.eq.s32.totalorder %s1003_s18, 1  ;;  %p131_p3 = scmp.ne.s32.totalorder %s1436_s13, %s1432_s12 }
   0x8   : > { %s1744_s20 = smov (%p30_p0, %s28_s20), 0  ;;  %p132_p5 = scmp.eq.s32.totalorder %s1004_s19, 1 }
   0x9   : > { %p1519_p4 = por %p126_p2, %p125_p1  ;;  %s110_s23 = ssub.s32 %s1448_s16, %s1744_s20 }
   0xa   : > { %p1009_p6 = scmp.ge.s32.totalorder %s1452_s17, 1  ;;  %p113_p7 = scmp.eq.s32.totalorder %s110_s23, 0 }
   0xb   : > { %p1526_p8 = por %p132_p5, %p131_p3  ;;  %p173_p9 = scmp.lt.s32.totalorder %s1452_s17, 3 }
   0xc   : > { %s1532_s25 = scalar_select %p113_p7, %s1440_s14, %s115_s21  }
   0xd   : > { %p174_p10 = pnand %p1009_p6, %p173_p9 }
   0xe   : > { %s1011_s5 = sshll.u32 (!%p174_p10), %s1444_s15, 5  ;;  %s202_s9 = sand.u32 (!%p174_p10), 1, %s1436_s13  }
   0xf   : > { %177 = sbr.rel (%p174_p10) target bundleno = 334 (0x14e), region = 32  ;;  %p206_p11 = scmp.lt.s32.totalorder (!%p174_p10), %s1011_s5, 63 }
  0x10   : > { %s1010_s10 = sshll.u32 (!%p174_p10), %s202_s9, 7  ;;  %s1143_s18 = sshll.u32 (!%p174_p10), %s1444_s15, 11 }
  0x11   : > { %s1679_s26 = scalar_lea.hbm (!%p174_p10), %s1735_s3, %s1143_s18  ;;  %s1687_s15 = scalar_lea.sflag (!%p174_p10), [#allocation3], %s202_s9 }
  0x12   : > { %s1456_s28 = smov (!%p174_p10), [#allocation2]  }
  0x13   : > { %s1380_s29 = sshll.u32 (!%p174_p10), %s1456_s28, 4  ;;  %s1381_s29 = int_to_ptr.vmem [resolvable:$false] %s1380_s29 }
  0x14   : > { %v1318_v0 = vld [vmem:[%s1733_s1 + $0x38] sm:$0xff]   ;;  %v1454_v1 = vmov 0   ;;  %v1319_v2 = vld [vmem:[%s1733_s1 + $0x30] sm:$0xff]   ;;  %v1320_v3 = vld [vmem:[%s1733_s1 + $0x28] sm:$0xff]   ;;  %s1746_s5 = smov (!%p206_p11, %s1011_s5), 63  ;;  %vm480_vm0 = vcmask 154624  }
  0x15   : > { %536 = vmatprep.subr.bf16.mxu0 %v1454_v1  ;;  %1239 = vmatprep.subr.bf16.mxu1 %v1454_v1  ;;  %v1321_v4 = vld [vmem:[%s1733_s1 + $0x20] sm:$0xff]   ;;  %s1110_s8 = sshll.u32 %s1746_s5, 3  ;;  %v1322_v5 = vld [vmem:[%s1733_s1 + $0x18] sm:$0xff]   ;;  %v1323_v8 = vld [vmem:[%s1733_s1 + $0x10] sm:$0xff]   ;;  %vm529_vm1 = vcmask 1040384   ;;  %vm530_vm2 = vcmask 1041408  }
  0x16   : > { %537 = vmatpush1.bf16.msra.mxu0 %v1318_v0  ;;  %1249 = vmatpush1.bf16.msra.mxu1 %v1318_v0  ;;  %s1550_s11 = scalar_lea.vmem %s1732_s0, %s1110_s8  ;;  %v1324_v9 = vld [vmem:[%s1733_s1 + $0x8] sm:$0xff]   ;;  %v1455_v10 = vmov 65535   ;;  %v1325_v12 = vld [vmem:[%s1733_s1] sm:$0xff]   ;;  %s1382_s30 = scalar_lea.vmem %s1381_s29, 4096 }
  0x17   : > { %538 = vmatprep.subr.bf16.mxu0 %v1454_v1  ;;  %1240 = vmatprep.subr.bf16.mxu1 %v1454_v1  ;;  %v1330_v6 = vld [vmem:[%s1550_s11 + $0x4] ss:$8 sps:$4 sm:$0xff]   ;;  %v531_v11 = vsel %vm529_vm1, 4294967295, %v1455_v10  ;;  %v1326_v13 = vld [vmem:[%s1733_s1 + $0x48] ss:$0 sps:$4 sm:$0x33]  }
  0x18   : > { %v1333_v7 = vld [vmem:[%s1550_s11 + $0x84] ss:$8 sps:$4 sm:$0xff]   ;;  %1057 = vmatprep.mubr.msk.bf16.mxu0 %vm480_vm0, %v1330_v6  ;;  %v532_v14 = vsel %vm530_vm2, %v531_v11, 0  ;;  %v1328_v17 = vld [vmem:[%s1550_s11] ss:$8 sps:$4 sm:$0xff]  }
  0x19   : > { %1065 = vmatprep.mubr.msk.bf16.mxu1 %vm480_vm0, %v1333_v7  ;;  %v534_v15 = vand.u32 %v1326_v13, %v532_v14  ;;  %v1327_v16 = vld [vmem:[%s1733_s1 + $0x40] sm:$0xff]   ;;  %v1334_v19 = vld [vmem:[%s1550_s11 + $0x14] ss:$8 sps:$4 sm:$0xff]   ;;  %v1338_v21 = vld [vmem:[%s1550_s11 + $0x10] ss:$8 sps:$4 sm:$0xff]  }
  0x1a   : > { %539 = vmatpush1.bf16.msra.mxu0 %v1319_v2  ;;  %1250 = vmatpush1.bf16.msra.mxu1 %v1319_v2  ;;  %v1331_v18 = vld [vmem:[%s1550_s11 + $0x80] ss:$8 sps:$4 sm:$0xff]   ;;  %v1336_v20 = vld [vmem:[%s1550_s11 + $0x94] ss:$8 sps:$4 sm:$0xff]   ;;  %v1339_v22 = vld [vmem:[%s1550_s11 + $0x90] ss:$8 sps:$4 sm:$0xff]  }
  0x1b   : > { %540 = vmatprep.subr.bf16.mxu0 %v1454_v1  ;;  %1241 = vmatprep.subr.bf16.mxu1 %v1454_v1  ;;  %v1340_v23 = vld [vmem:[%s1550_s11 + $0x24] ss:$8 sps:$4 sm:$0xff]   ;;  %v1344_v25 = vld [vmem:[%s1550_s11 + $0x20] ss:$8 sps:$4 sm:$0xff]   ;;  %v1346_v27 = vld [vmem:[%s1550_s11 + $0x34] ss:$8 sps:$4 sm:$0xff]  }
  0x1c   : > { %v1342_v24 = vld [vmem:[%s1550_s11 + $0xa4] ss:$8 sps:$4 sm:$0xff]   ;;  %v1345_v26 = vld [vmem:[%s1550_s11 + $0xa0] ss:$8 sps:$4 sm:$0xff]   ;;  %v1348_v28 = vld [vmem:[%s1550_s11 + $0xb4] ss:$8 sps:$4 sm:$0xff]  }
  0x1d   : > { %v1350_v29 = vld [vmem:[%s1550_s11 + $0x30] ss:$8 sps:$4 sm:$0xff]   ;;  %v1352_v31 = vld [vmem:[%s1550_s11 + $0x44] ss:$8 sps:$4 sm:$0xff]   ;;  %v1356_v33 = vld [vmem:[%s1550_s11 + $0x40] ss:$8 sps:$4 sm:$0xff]  }
  0x1e   : > { %541 = vmatpush1.bf16.msra.mxu0 %v1320_v3  ;;  %1251 = vmatpush1.bf16.msra.mxu1 %v1320_v3  ;;  %v1351_v30 = vld [vmem:[%s1550_s11 + $0xb0] ss:$8 sps:$4 sm:$0xff]   ;;  %v1354_v32 = vld [vmem:[%s1550_s11 + $0xc4] ss:$8 sps:$4 sm:$0xff]   ;;  %v1357_v34 = vld [vmem:[%s1550_s11 + $0xc0] ss:$8 sps:$4 sm:$0xff]  }
  0x1f   : > { %542 = vmatprep.subr.bf16.mxu0 %v1454_v1  ;;  %1242 = vmatprep.subr.bf16.mxu1 %v1454_v1  ;;  %v1358_v35 = vld [vmem:[%s1550_s11 + $0x54] ss:$8 sps:$4 sm:$0xff]   ;;  %v1362_v37 = vld [vmem:[%s1550_s11 + $0x50] ss:$8 sps:$4 sm:$0xff]   ;;  %v1364_v39 = vld [vmem:[%s1550_s11 + $0x64] ss:$8 sps:$4 sm:$0xff]  }
  0x20   : > { %v1360_v36 = vld [vmem:[%s1550_s11 + $0xd4] ss:$8 sps:$4 sm:$0xff]   ;;  %v1363_v38 = vld [vmem:[%s1550_s11 + $0xd0] ss:$8 sps:$4 sm:$0xff]   ;;  %v1366_v40 = vld [vmem:[%s1550_s11 + $0xe4] ss:$8 sps:$4 sm:$0xff]  }
  0x21   : > { %v1368_v41 = vld [vmem:[%s1550_s11 + $0x60] ss:$8 sps:$4 sm:$0xff]   ;;  %v1370_v43 = vld [vmem:[%s1550_s11 + $0x74] ss:$8 sps:$4 sm:$0xff]   ;;  %v1374_v45 = vld [vmem:[%s1550_s11 + $0x70] ss:$8 sps:$4 sm:$0xff]  }
  0x22   : > { %543 = vmatpush1.bf16.msra.mxu0 %v1321_v4  ;;  %1252 = vmatpush1.bf16.msra.mxu1 %v1321_v4  ;;  %v1369_v42 = vld [vmem:[%s1550_s11 + $0xe0] ss:$8 sps:$4 sm:$0xff]   ;;  %v1372_v44 = vld [vmem:[%s1550_s11 + $0xf4] ss:$8 sps:$4 sm:$0xff]   ;;  %v1375_v46 = vld [vmem:[%s1550_s11 + $0xf0] ss:$8 sps:$4 sm:$0xff]  }
  0x23   : > { %544 = vmatprep.subr.bf16.mxu0 %v1454_v1  ;;  %1243 = vmatprep.subr.bf16.mxu1 %v1454_v1  ;;  %v1621_v47 = vld [vmem:[%s1734_s2] ss:$0 sm:$0xff]  ;;  %s1630_s11 = scalar_lea.vmem [#allocation2], %s1010_s10 }
  0x24   : > { %s904_s19 = sshll.u32 %s1630_s11, 4  ;;  %s1681_s19 = int_to_ptr.vmem [resolvable:$true] %s904_s19 }
  0x25   : > { %s1376_s27 = scalar_lea.vmem %s1681_s19, 2048  ;;  %p1383_p1 = scmp.lt.s32.totalorder %s1681_s19, %s1381_s29 }
  0x26   : > { %545 = vmatpush1.bf16.msra.mxu0 %v1322_v5  ;;  %1253 = vmatpush1.bf16.msra.mxu1 %v1322_v5  ;;  %p1377_p12 = scmp.ne.s32.totalorder %s1681_s19, %s1376_s27  ;;  %p1384_p2 = scmp.lt.s32.totalorder %s1382_s30, %s1376_s27 }
  0x27   : > { %546 = vmatprep.subr.bf16.mxu0 %v1454_v1  ;;  %1244 = vmatprep.subr.bf16.mxu1 %v1454_v1 }
  0x28   : > { %p1378_p13 = pnand %p1377_p12, %p1519_p4  ;;  %p1385_p3 = por %p1384_p2, %p1383_p1 }
  0x2a   : > { %547 = vmatpush1.bf16.msra.mxu0 %v1323_v8  ;;  %1254 = vmatpush1.bf16.msra.mxu1 %v1323_v8  ;;  %p1379_p0 = pneg %p1378_p13 }
  0x2b   : > { %548 = vmatprep.subr.bf16.mxu0 %v1454_v1  ;;  %1245 = vmatprep.subr.bf16.mxu1 %v1454_v1 }
  0x2c   : > { %p1386_p5 = pnand %p1385_p3, %p1379_p0 }
  0x2e   : > { %549 = vmatpush1.bf16.msra.mxu0 %v1324_v9  ;;  %1255 = vmatpush1.bf16.msra.mxu1 %v1324_v9 }
  0x2f   : > { %550 = vmatprep.subr.bf16.mxu0 %v1454_v1  ;;  %1246 = vmatprep.subr.bf16.mxu1 %v1454_v1 }
  0x32   : > { %551 = vmatpush1.bf16.msra.mxu0 %v1325_v12  ;;  %1256 = vmatpush1.bf16.msra.mxu1 %v1325_v12 }
  0x33   : > { %564 = vmatprep.subr.bf16.mxu0 %v1454_v1  ;;  %1247 = vmatprep.subr.bf16.mxu1 %v1454_v1 }
  0x36   : > { %565 = vmatpush2.bf16.msra.mxu0 %v534_v15  ;;  %1257 = vmatpush2.bf16.msra.mxu1 %v534_v15 }
  0x37   : > { %566 = vmatprep.subr.bf16.mxu0 %v1454_v1  ;;  %1248 = vmatprep.subr.bf16.mxu1 %v1454_v1 }
  0x3a   : > { %567 = vmatpush2.bf16.msra.mxu0 %v1327_v16  ;;  %1258 = vmatpush2.bf16.msra.mxu1 %v1327_v16 }
  0x3d   : > { %569 = vmatmul.mubr.bf16.vlgmr.msra.gmra.mxu0 %v1328_v17  ;;  %633 = vmatmul.mubr.bf16.vlgmr.msra.gmra.mxu1 %v1331_v18 }
  0x3e   : > { %1058 = vmatprep.mubr.msk.bf16.mxu0 %vm480_vm0, %v1334_v19  ;;  %1066 = vmatprep.mubr.msk.bf16.mxu1 %vm480_vm0, %v1336_v20 }
  0x45   : > { %577 = vmatmul.mubr.bf16.gmra.mxu0 %v1338_v21  ;;  %641 = vmatmul.mubr.bf16.gmra.mxu1 %v1339_v22 }
  0x46   : > { %1059 = vmatprep.mubr.msk.bf16.mxu0 %vm480_vm0, %v1340_v23  ;;  %1067 = vmatprep.mubr.msk.bf16.mxu1 %vm480_vm0, %v1342_v24 }
  0x4d   : > { %585 = vmatmul.mubr.bf16.gmra.mxu0 %v1344_v25  ;;  %649 = vmatmul.mubr.bf16.gmra.mxu1 %v1345_v26 }
  0x4e   : > { %1060 = vmatprep.mubr.msk.bf16.mxu0 %vm480_vm0, %v1346_v27  ;;  %1068 = vmatprep.mubr.msk.bf16.mxu1 %vm480_vm0, %v1348_v28 }
  0x55   : > { %593 = vmatmul.mubr.bf16.gmra.mxu0 %v1350_v29  ;;  %657 = vmatmul.mubr.bf16.gmra.mxu1 %v1351_v30 }
  0x56   : > { %1061 = vmatprep.mubr.msk.bf16.mxu0 %vm480_vm0, %v1352_v31  ;;  %1069 = vmatprep.mubr.msk.bf16.mxu1 %vm480_vm0, %v1354_v32 }
  0x5d   : > { %601 = vmatmul.mubr.bf16.gmra.mxu0 %v1356_v33  ;;  %665 = vmatmul.mubr.bf16.gmra.mxu1 %v1357_v34 }
  0x5e   : > { %1062 = vmatprep.mubr.msk.bf16.mxu0 %vm480_vm0, %v1358_v35  ;;  %1070 = vmatprep.mubr.msk.bf16.mxu1 %vm480_vm0, %v1360_v36 }
  0x65   : > { %609 = vmatmul.mubr.bf16.gmra.mxu0 %v1362_v37  ;;  %673 = vmatmul.mubr.bf16.gmra.mxu1 %v1363_v38 }
  0x66   : > { %1063 = vmatprep.mubr.msk.bf16.mxu0 %vm480_vm0, %v1364_v39  ;;  %1071 = vmatprep.mubr.msk.bf16.mxu1 %vm480_vm0, %v1366_v40 }
  0x6d   : > { %617 = vmatmul.mubr.bf16.gmra.mxu0 %v1368_v41  ;;  %681 = vmatmul.mubr.bf16.gmra.mxu1 %v1369_v42 }
  0x6e   : > { %1064 = vmatprep.mubr.msk.bf16.mxu0 %vm480_vm0, %v1370_v43  ;;  %1072 = vmatprep.mubr.msk.bf16.mxu1 %vm480_vm0, %v1372_v44 }
  0x75   : > { %625 = vmatmul.mubr.bf16.gmra.mxu0 %v1374_v45  ;;  %689 = vmatmul.mubr.bf16.gmra.mxu1 %v1375_v46 }
  0xfd   : > { %v570_v48 = vpop.f32.mrf.mxu0  ;;  %v634_v49 = vpop.f32.mrf.mxu1 }
  0xfe   : > { %v571_v52 = vadd.f32 %v1621_v47, %v570_v48  ;;  %v635_v53 = vadd.f32 %v1621_v47, %v634_v49 }
  0xff   : > { %v572_v50 = vpop.f32.mrf.mxu0  ;;  %v636_v51 = vpop.f32.mrf.mxu1 }
 0x100   : > { %v697_v60 = vmax.f32 %v571_v52, 0.0  ;;  %v713_v61 = vmax.f32 %v635_v53, 0.0 }
 0x101   : > { %v573_v54 = vpop.f32.mrf.mxu0  ;;  %v637_v55 = vpop.f32.mrf.mxu1 }
 0x102   : > { %v574_v56 = vadd.f32 %v1621_v47, %v573_v54  ;;  %v638_v57 = vadd.f32 %v1621_v47, %v637_v55 }
 0x103   : > { %v575_v58 = vpop.f32.mrf.mxu0  ;;  %v639_v59 = vpop.f32.mrf.mxu1 }
 0x104   : > { %v698_v62 = vmax.f32 %v574_v56, 0.0  ;;  %v714_v63 = vmax.f32 %v638_v57, 0.0 }
 0x105   : > { %v578_v0 = vpop.f32.mrf.mxu0  ;;  %v642_v1 = vpop.f32.mrf.mxu1 }
 0x106   : > { %v1147_v2 = vpack.c.bf16 %v698_v62, %v697_v60  ;;  %v1187_v3 = vpack.c.bf16 %v714_v63, %v713_v61  ;;  %v579_v6 = vadd.f32 %v1621_v47, %v578_v0  ;;  %v643_v7 = vadd.f32 %v1621_v47, %v642_v1 }
 0x107   : > { %v580_v4 = vpop.f32.mrf.mxu0  ;;  %v644_v5 = vpop.f32.mrf.mxu1 }
 0x108   : > { %1148 = vst [vmem:[%s1630_s11] sm:$0xff] %v1147_v2   ;;  %1231 = vst [vmem:[%s1630_s11 + $0x40] sm:$0xff] %v1187_v3   ;;  %v699_v14 = vmax.f32 %v579_v6, 0.0  ;;  %v715_v15 = vmax.f32 %v643_v7, 0.0 }
 0x109   : > { %v581_v8 = vpop.f32.mrf.mxu0  ;;  %v645_v9 = vpop.f32.mrf.mxu1 }
 0x10a   : > { %v582_v10 = vadd.f32 %v1621_v47, %v581_v8  ;;  %v646_v11 = vadd.f32 %v1621_v47, %v645_v9 }
 0x10b   : > { %v583_v12 = vpop.f32.mrf.mxu0  ;;  %v647_v13 = vpop.f32.mrf.mxu1 }
 0x10c   : > { %v700_v16 = vmax.f32 %v582_v10, 0.0  ;;  %v716_v17 = vmax.f32 %v646_v11, 0.0 }
 0x10d   : > { %v586_v18 = vpop.f32.mrf.mxu0  ;;  %v650_v19 = vpop.f32.mrf.mxu1 }
 0x10e   : > { %v1152_v20 = vpack.c.bf16 %v700_v16, %v699_v14  ;;  %v1192_v21 = vpack.c.bf16 %v716_v17, %v715_v15  ;;  %v587_v24 = vadd.f32 %v1621_v47, %v586_v18  ;;  %v651_v25 = vadd.f32 %v1621_v47, %v650_v19 }
 0x10f   : > { %v588_v22 = vpop.f32.mrf.mxu0  ;;  %v652_v23 = vpop.f32.mrf.mxu1 }
 0x110   : > { %1224 = vst [vmem:[%s1630_s11 + $0x8] sm:$0xff] %v1152_v20   ;;  %1232 = vst [vmem:[%s1630_s11 + $0x48] sm:$0xff] %v1192_v21   ;;  %v701_v32 = vmax.f32 %v587_v24, 0.0  ;;  %v717_v33 = vmax.f32 %v651_v25, 0.0 }
 0x111   : > { %v589_v26 = vpop.f32.mrf.mxu0  ;;  %v653_v27 = vpop.f32.mrf.mxu1 }
 0x112   : > { %v590_v28 = vadd.f32 %v1621_v47, %v589_v26  ;;  %v654_v29 = vadd.f32 %v1621_v47, %v653_v27 }
 0x113   : > { %v591_v30 = vpop.f32.mrf.mxu0  ;;  %v655_v31 = vpop.f32.mrf.mxu1 }
 0x114   : > { %v702_v34 = vmax.f32 %v590_v28, 0.0  ;;  %v718_v35 = vmax.f32 %v654_v29, 0.0 }
 0x115   : > { %v594_v36 = vpop.f32.mrf.mxu0  ;;  %v658_v37 = vpop.f32.mrf.mxu1 }
 0x116   : > { %v1157_v38 = vpack.c.bf16 %v702_v34, %v701_v32  ;;  %v1197_v39 = vpack.c.bf16 %v718_v35, %v717_v33  ;;  %v595_v42 = vadd.f32 %v1621_v47, %v594_v36  ;;  %v659_v43 = vadd.f32 %v1621_v47, %v658_v37 }
 0x117   : > { %v596_v40 = vpop.f32.mrf.mxu0  ;;  %v660_v41 = vpop.f32.mrf.mxu1 }
 0x118   : > { %1225 = vst [vmem:[%s1630_s11 + $0x10] sm:$0xff] %v1157_v38   ;;  %1233 = vst [vmem:[%s1630_s11 + $0x50] sm:$0xff] %v1197_v39   ;;  %v703_v51 = vmax.f32 %v595_v42, 0.0  ;;  %v719_v52 = vmax.f32 %v659_v43, 0.0 }
 0x119   : > { %v597_v44 = vpop.f32.mrf.mxu0  ;;  %v661_v45 = vpop.f32.mrf.mxu1 }
 0x11a   : > { %v598_v46 = vadd.f32 %v1621_v47, %v597_v44  ;;  %v662_v48 = vadd.f32 %v1621_v47, %v661_v45 }
 0x11b   : > { %v599_v49 = vpop.f32.mrf.mxu0  ;;  %v663_v50 = vpop.f32.mrf.mxu1 }
 0x11c   : > { %v704_v53 = vmax.f32 %v598_v46, 0.0  ;;  %v720_v54 = vmax.f32 %v662_v48, 0.0 }
 0x11d   : > { %v602_v55 = vpop.f32.mrf.mxu0  ;;  %v666_v56 = vpop.f32.mrf.mxu1 }
 0x11e   : > { %v1162_v57 = vpack.c.bf16 %v704_v53, %v703_v51  ;;  %v1202_v58 = vpack.c.bf16 %v720_v54, %v719_v52  ;;  %v603_v61 = vadd.f32 %v1621_v47, %v602_v55  ;;  %v667_v62 = vadd.f32 %v1621_v47, %v666_v56 }
 0x11f   : > { %v604_v59 = vpop.f32.mrf.mxu0  ;;  %v668_v60 = vpop.f32.mrf.mxu1 }
 0x120   : > { %1226 = vst [vmem:[%s1630_s11 + $0x18] sm:$0xff] %v1162_v57   ;;  %1234 = vst [vmem:[%s1630_s11 + $0x58] sm:$0xff] %v1202_v58   ;;  %v705_v5 = vmax.f32 %v603_v61, 0.0  ;;  %v721_v6 = vmax.f32 %v667_v62, 0.0 }
 0x121   : > { %v605_v63 = vpop.f32.mrf.mxu0  ;;  %v669_v0 = vpop.f32.mrf.mxu1 }
 0x122   : > { %v606_v1 = vadd.f32 %v1621_v47, %v605_v63  ;;  %v670_v2 = vadd.f32 %v1621_v47, %v669_v0 }
 0x123   : > { %v607_v3 = vpop.f32.mrf.mxu0  ;;  %v671_v4 = vpop.f32.mrf.mxu1 }
 0x124   : > { %v706_v7 = vmax.f32 %v606_v1, 0.0  ;;  %v722_v8 = vmax.f32 %v670_v2, 0.0 }
 0x125   : > { %v610_v9 = vpop.f32.mrf.mxu0  ;;  %v674_v10 = vpop.f32.mrf.mxu1 }
 0x126   : > { %v1167_v11 = vpack.c.bf16 %v706_v7, %v705_v5  ;;  %v1207_v12 = vpack.c.bf16 %v722_v8, %v721_v6  ;;  %v611_v15 = vadd.f32 %v1621_v47, %v610_v9  ;;  %v675_v16 = vadd.f32 %v1621_v47, %v674_v10 }
 0x127   : > { %v612_v13 = vpop.f32.mrf.mxu0  ;;  %v676_v14 = vpop.f32.mrf.mxu1 }
 0x128   : > { %1227 = vst [vmem:[%s1630_s11 + $0x20] sm:$0xff] %v1167_v11   ;;  %1235 = vst [vmem:[%s1630_s11 + $0x60] sm:$0xff] %v1207_v12   ;;  %v707_v23 = vmax.f32 %v611_v15, 0.0  ;;  %v723_v24 = vmax.f32 %v675_v16, 0.0 }
 0x129   : > { %v613_v17 = vpop.f32.mrf.mxu0  ;;  %v677_v18 = vpop.f32.mrf.mxu1 }
 0x12a   : > { %v614_v19 = vadd.f32 %v1621_v47, %v613_v17  ;;  %v678_v20 = vadd.f32 %v1621_v47, %v677_v18 }
 0x12b   : > { %v615_v21 = vpop.f32.mrf.mxu0  ;;  %v679_v22 = vpop.f32.mrf.mxu1 }
 0x12c   : > { %v708_v25 = vmax.f32 %v614_v19, 0.0  ;;  %v724_v26 = vmax.f32 %v678_v20, 0.0 }
 0x12d   : > { %v618_v27 = vpop.f32.mrf.mxu0  ;;  %v682_v28 = vpop.f32.mrf.mxu1 }
 0x12e   : > { %v1172_v29 = vpack.c.bf16 %v708_v25, %v707_v23  ;;  %v1212_v30 = vpack.c.bf16 %v724_v26, %v723_v24  ;;  %v619_v33 = vadd.f32 %v1621_v47, %v618_v27  ;;  %v683_v34 = vadd.f32 %v1621_v47, %v682_v28 }
 0x12f   : > { %v620_v31 = vpop.f32.mrf.mxu0  ;;  %v684_v32 = vpop.f32.mrf.mxu1 }
 0x130   : > { %1228 = vst [vmem:[%s1630_s11 + $0x28] sm:$0xff] %v1172_v29   ;;  %1236 = vst [vmem:[%s1630_s11 + $0x68] sm:$0xff] %v1212_v30   ;;  %v709_v41 = vmax.f32 %v619_v33, 0.0  ;;  %v725_v42 = vmax.f32 %v683_v34, 0.0 }
 0x131   : > { %v621_v35 = vpop.f32.mrf.mxu0  ;;  %v685_v36 = vpop.f32.mrf.mxu1 }
 0x132   : > { %v622_v37 = vadd.f32 %v1621_v47, %v621_v35  ;;  %v686_v38 = vadd.f32 %v1621_v47, %v685_v36 }
 0x133   : > { %v623_v39 = vpop.f32.mrf.mxu0  ;;  %v687_v40 = vpop.f32.mrf.mxu1 }
 0x134   : > { %v710_v43 = vmax.f32 %v622_v37, 0.0  ;;  %v726_v44 = vmax.f32 %v686_v38, 0.0 }
 0x135   : > { %v626_v45 = vpop.f32.mrf.mxu0  ;;  %v690_v46 = vpop.f32.mrf.mxu1 }
 0x136   : > { %v1177_v48 = vpack.c.bf16 %v710_v43, %v709_v41  ;;  %v1217_v49 = vpack.c.bf16 %v726_v44, %v725_v42  ;;  %v627_v52 = vadd.f32 %v1621_v47, %v626_v45  ;;  %v691_v53 = vadd.f32 %v1621_v47, %v690_v46 }
 0x137   : > { %v628_v50 = vpop.f32.mrf.mxu0  ;;  %v692_v51 = vpop.f32.mrf.mxu1 }
 0x138   : > { %1229 = vst [vmem:[%s1630_s11 + $0x30] sm:$0xff] %v1177_v48   ;;  %1237 = vst [vmem:[%s1630_s11 + $0x70] sm:$0xff] %v1217_v49   ;;  %v711_v60 = vmax.f32 %v627_v52, 0.0  ;;  %v727_v61 = vmax.f32 %v691_v53, 0.0 }
 0x139   : > { %v629_v54 = vpop.f32.mrf.mxu0  ;;  %v693_v55 = vpop.f32.mrf.mxu1 }
 0x13a   : > { %v630_v56 = vadd.f32 %v1621_v47, %v629_v54  ;;  %v694_v57 = vadd.f32 %v1621_v47, %v693_v55 }
 0x13b   : > { %v631_v58 = vpop.f32.mrf.mxu0  ;;  %v695_v59 = vpop.f32.mrf.mxu1 }
 0x13c   : > { %v712_v62 = vmax.f32 %v630_v56, 0.0  ;;  %v728_v63 = vmax.f32 %v694_v57, 0.0 }
 0x13e   : > { %v1182_v47 = vpack.c.bf16 %v712_v62, %v711_v60  ;;  %v1222_v0 = vpack.c.bf16 %v728_v63, %v727_v61 }
 0x140   : > { %1230 = vst [vmem:[%s1630_s11 + $0x38] sm:$0xff] %v1182_v47   ;;  %1238 = vst [vmem:[%s1630_s11 + $0x78] sm:$0xff] %v1222_v0  }
 0x141   : > { %1389 = shalt.err (!%p1386_p5)
}
 0x142   : > { %s1390_s4 = scalar_lea.hbm %s1679_s26, 2048  ;;  %s1394_s7 = scalar_lea.hbm %s1735_s3, 4096 }
 0x143   : > { %p1391_p6 = scmp.ne.s32.totalorder %s1679_s26, %s1390_s4  ;;  %p1395_p10 = scmp.lt.s32.totalorder %s1679_s26, %s1735_s3 }
 0x144   : > { %p1396_p11 = scmp.lt.s32.totalorder %s1394_s7, %s1390_s4 }
 0x145   : > { %p1392_p7 = pnand %p1391_p6, %p1519_p4 }
 0x146   : > { %p1397_p12 = por %p1396_p11, %p1395_p10 }
 0x147   : > { %p1393_p9 = pneg %p1392_p7 }
 0x149   : > { %p1398_p13 = pnand %p1397_p12, %p1393_p9 }
 0x14b   : > { %1401 = shalt.err (!%p1398_p13)
}
 0x14c   : > { %s1457_s10 = smov 64   ;;  %s1458_s11 = smov 4  }
 0x14d   : > { %1259 = dma.vmem_to_hbm [thread:$0]  (%p1519_p4), %s1681_s19, 2048, %s1679_s26, %s1687_s15, %s1457_s10, %s1457_s10, %s1458_s11  }
 0x14e PF: > { %p1265_p0 = scmp.ge.s32.totalorder %s1452_s17, 2  ;;  %s919_s18 = sand.u32 1, %s1432_s12  }
 0x14f   : > { %s920_s21 = scalar_lea.sflag [#allocation3], %s919_s18 }
 0x150   : > { %p1262_p1 = pnand %p1265_p0, %p1526_p8 }
 0x152   : > { %p1263_p2 = pneg %p1262_p1 }
 0x154   : > { %1427 = dma.done.wait (%p1263_p2), %s920_s21, 2048  }
 0x155   : > { %1429 = vsyncadd (%p1263_p2), %s920_s21, 4294965248  ;;  %s16_s17 = sadd.s32 1, %s1452_s17   ;;  %s1738_s12 = smov %s1436_s13 }
 0x156   : > { %p13_p3 = scmp.ge.s32.totalorder %s16_s17, 4   ;;  %s1739_s13 = smov %s1440_s14 }
 0x157   : > { %s1740_s14 = smov %s1532_s25  ;;  %s1741_s15 = smov %s1448_s16 }
 0x158   : > { %s1742_s16 = smov %s1744_s20  ;;  %15 = sbr.rel (!%p13_p3) target bundleno = 4 (0x4), region = 73 }
 0x15d   :  { %925 = vsyncpa [#allocation3], 1 }
 0x15e   :  { %927 = vsyncpa [#allocation3 + $0x1], 1 }

</bundles_post_ra>
